<compile_context>
chip_gen: v7x
topology: tpu7x:2x2x1
jax: 0.10.0
libtpu: 0.0.40
codegen_flags: <defaults>
</compile_context>

<pallas_src>
import functools

import jax
import jax.numpy as jnp
from jax.experimental import pallas as pl
from jax.experimental.pallas import tpu as pltpu


def _round_up(x, m):
    return ((x + m - 1) // m) * m


def linear_kernel(x_ref, w_ref, b_ref, o_ref):
    """One (tm, tn) output tile; K is the innermost ('arbitrary') grid axis.

    x_ref: (tm, tk) f32
    w_ref: (tk, tn) f32   (weight pre-transposed once in the wrapper)
    b_ref: (1, tn)  f32
    o_ref: (tm, tn) f32   -- used directly as the accumulator (no scratch).
    """
    k = pl.program_id(2)

    @pl.when(k == 0)
    def _():
        o_ref[...] = jnp.zeros_like(o_ref)

    o_ref[...] += jnp.dot(x_ref[...], w_ref[...],
                          preferred_element_type=jnp.float32)

    @pl.when(k == pl.num_programs(2) - 1)
    def _():
        o_ref[...] += b_ref[...]          # bias added exactly once


def _device_tile_defaults():
    """Per-generation tile sizes + scoped-VMEM limit (f32 operands)."""
    try:
        kind = jax.devices()[0].device_kind.lower()
    except Exception:  # pragma: no cover - defensive
        kind = ""
    if "v5" in kind:
        # 1 vst slot, 16 MiB scoped default: modest tiles, spend VMEM on tk.
        return dict(tm=256, tn=512, tk=1024, vmem_limit=64 << 20, cores=1)
    if "v6" in kind:
        # 128 MiB physical VMEM: bigger M/N tiles cut HBM re-streaming.
        return dict(tm=512, tn=1024, tk=1024, vmem_limit=100 << 20, cores=1)
    if "v7" in kind:
        # 64 MiB per-TC VMEM, 2 TensorCores/chip.
        return dict(tm=512, tn=1024, tk=1024, vmem_limit=48 << 20, cores=2)
    # Unknown: conservative sizes, leave the scoped-VMEM default alone.
    return dict(tm=256, tn=512, tk=1024, vmem_limit=None, cores=1)


def make_linear_regression(weight, bias):
    """Build a forward fn for y = x @ weight.T + bias (exact nn.Linear).

    weight: (D_out, D_in) f32 (PyTorch layout), bias: (D_out,) f32.
    Weight transpose + padding happen ONCE here, not per forward call.
    """
    cfg = _device_tile_defaults()
    D_out, D_in = weight.shape

    tn = min(cfg["tn"], _round_up(D_out, 128))
    tk = min(cfg["tk"], _round_up(D_in, 128))

    # v7x: guarantee >= 2 (M, N) tiles in the common small-batch case so both
    # TensorCores get work (split N; keep tn a lane-dense multiple of 128).
    N128 = _round_up(D_out, 128)
    if cfg["cores"] >= 2 and N128 >= 256 and tn >= N128:
        tn = _round_up(N128 // 2, 128)

    K_p = _round_up(D_in, tk)
    N_p = _round_up(D_out, tn)

    # One-time transform of static params: transpose + zero-pad.
    w_t = jnp.pad(weight.T, ((0, K_p - D_in), (0, N_p - D_out)))   # (K_p, N_p)
    b_p = jnp.pad(bias, (0, N_p - D_out)).reshape(1, N_p)          # (1, N_p)

    tm_cap, vmem_limit = cfg["tm"], cfg["vmem_limit"]

    def forward(x):
        B = x.shape[0]
        tm = min(tm_cap, _round_up(B, 8))
        B_p = _round_up(B, tm)

        # Only pad x when B / D_in aren't already tile-aligned.
        if B_p != B or K_p != D_in:
            x_p = jnp.pad(x, ((0, B_p - B), (0, K_p - D_in)))
        else:
            x_p = x

        grid = (B_p // tm, N_p // tn, K_p // tk)

        cost = pl.CostEstimate(
            flops=2 * B_p * K_p * N_p,
            transcendentals=0,
            # Account for re-streaming: x read once per N tile, w once per M tile.
            bytes_accessed=4 * (B_p * K_p * grid[1]
                                + K_p * N_p * grid[0]
                                + B_p * N_p + N_p),
        )

        out_p = pl.pallas_call(
            linear_kernel,
            out_shape=jax.ShapeDtypeStruct((B_p, N_p), jnp.float32),
            grid_spec=pltpu.PrefetchScalarGridSpec(
                num_scalar_prefetch=0,
                grid=grid,
                in_specs=[
                    pl.BlockSpec((tm, tk), lambda i, j, k: (i, k)),   # x tile
                    pl.BlockSpec((tk, tn), lambda i, j, k: (k, j)),   # w^T tile
                    pl.BlockSpec((1, tn), lambda i, j, k: (0, j)),    # bias tile
                ],
                out_specs=pl.BlockSpec((tm, tn), lambda i, j, k: (i, j)),
            ),
            compiler_params=pltpu.CompilerParams(
                dimension_semantics=("parallel", "parallel", "arbitrary"),
                vmem_limit_bytes=vmem_limit,
            ),
            cost_estimate=cost,
        )(x_p, w_t, b_p)

        return out_p[:B, :D_out]

    return jax.jit(forward)


if __name__ == "__main__":
    # Small shapes consistent with LinearRegression(input_dim, output_dim).
    batch, input_dim, output_dim = 8, 32, 16

    key = jax.random.PRNGKey(0)
    kx, kw, kb = jax.random.split(key, 3)

    x = jax.random.normal(kx, (batch, input_dim), dtype=jnp.float32)
    # Deterministic init mimicking nn.Linear's uniform(-1/sqrt(fan_in), ...).
    bound = 1.0 / jnp.sqrt(jnp.float32(input_dim))
    weight = jax.random.uniform(kw, (output_dim, input_dim),
                                minval=-bound, maxval=bound, dtype=jnp.float32)
    bias = jax.random.uniform(kb, (output_dim,),
                              minval=-bound, maxval=bound, dtype=jnp.float32)

    forward = make_linear_regression(weight, bias)
    y = forward(x)
    jax.block_until_ready(y)

    # Reference check against plain JAX (same semantics as torch nn.Linear).
    y_ref = x @ weight.T + bias
    assert y.shape == (batch, output_dim)
    assert jnp.allclose(y, y_ref, atol=1e-5, rtol=1e-5)

    print("KERNEL_OK")
</pallas_src>

<mosaic_0001>
module attributes {stable_mosaic.version = 11 : i64} {
  func.func @linear_kernel(%arg0: i32, %arg1: i32, %arg2: i32, %arg3: memref<8x128xf32, #tpu.memory_space<vmem>>, %arg4: memref<128x128xf32, #tpu.memory_space<vmem>>, %arg5: memref<1x128xf32, #tpu.memory_space<vmem>>, %arg6: memref<8x128xf32, #tpu.memory_space<vmem>>) attributes {dimension_semantics = [#tpu.dimension_semantics<parallel>, #tpu.dimension_semantics<parallel>, #tpu.dimension_semantics<arbitrary>], iteration_bounds = array<i64: 1, 1, 1>, scalar_prefetch = 0 : i64, scratch_operands = 0 : i64, tpu.core_type = #tpu.core_type<tc>, window_params = [{transform_indices = @transform_0, window_bounds = array<i64: 8, 128>}, {transform_indices = @transform_1, window_bounds = array<i64: 128, 128>}, {transform_indices = @transform_2, window_bounds = array<i64: 1, 128>}, {transform_indices = @transform_3, window_bounds = array<i64: 8, 128>}]} {
    %c0_i32 = arith.constant 0 : i32
    %0 = arith.cmpi eq, %arg2, %c0_i32 : i32
    %1 = arith.extui %0 : i1 to i32
    %c0_i32_0 = arith.constant 0 : i32
    %2 = arith.cmpi ne, %1, %c0_i32_0 : i32
    scf.if %2 {
      %cst_10 = arith.constant 0.000000e+00 : f32
      %12 = vector.broadcast %cst_10 : f32 to vector<8x128xf32>
      %c0_11 = arith.constant 0 : index
      %c0_12 = arith.constant 0 : index
      %13 = vector.load %arg6[%c0_11, %c0_12] : memref<8x128xf32, #tpu.memory_space<vmem>>, vector<8x128xf32>
      tpu.vector_store %arg6[%c0_11, %c0_12], %12 {strides = array<i32>} : memref<8x128xf32, #tpu.memory_space<vmem>>, vector<8x128xf32>,
    } else {
    }
    %c0 = arith.constant 0 : index
    %c0_1 = arith.constant 0 : index
    %3 = vector.load %arg6[%c0, %c0_1] : memref<8x128xf32, #tpu.memory_space<vmem>>, vector<8x128xf32>
    %c0_2 = arith.constant 0 : index
    %c0_3 = arith.constant 0 : index
    %4 = vector.load %arg3[%c0_2, %c0_3] : memref<8x128xf32, #tpu.memory_space<vmem>>, vector<8x128xf32>
    %c0_4 = arith.constant 0 : index
    %c0_5 = arith.constant 0 : index
    %5 = vector.load %arg4[%c0_4, %c0_5] : memref<128x128xf32, #tpu.memory_space<vmem>>, vector<128x128xf32>
    %cst = arith.constant dense<0.000000e+00> : vector<8x128xf32>
    %6 = tpu.matmul %4, %5, %cst {dimension_numbers = #tpu.dot_dimension_numbers<[1], [0], [0], [1], [0, 0, 1, 1], [], []>} : vector<8x128xf32>, vector<128x128xf32>, vector<8x128xf32> -> vector<8x128xf32>
    %7 = arith.addf %3, %6 : vector<8x128xf32>
    %c0_6 = arith.constant 0 : index
    %c0_7 = arith.constant 0 : index
    %8 = vector.load %arg6[%c0_6, %c0_7] : memref<8x128xf32, #tpu.memory_space<vmem>>, vector<8x128xf32>
    tpu.vector_store %arg6[%c0_6, %c0_7], %7 {strides = array<i32>} : memref<8x128xf32, #tpu.memory_space<vmem>>, vector<8x128xf32>,
    %c0_i32_8 = arith.constant 0 : i32
    %9 = arith.cmpi eq, %arg2, %c0_i32_8 : i32
    %10 = arith.extui %9 : i1 to i32
    %c0_i32_9 = arith.constant 0 : i32
    %11 = arith.cmpi ne, %10, %c0_i32_9 : i32
    scf.if %11 {
      %c0_10 = arith.constant 0 : index
      %c0_11 = arith.constant 0 : index
      %12 = vector.load %arg6[%c0_10, %c0_11] : memref<8x128xf32, #tpu.memory_space<vmem>>, vector<8x128xf32>
      %c0_12 = arith.constant 0 : index
      %c0_13 = arith.constant 0 : index
      %13 = vector.load %arg5[%c0_12, %c0_13] : memref<1x128xf32, #tpu.memory_space<vmem>>, vector<1x128xf32>
      %14 = vector.broadcast %13 : vector<1x128xf32> to vector<8x128xf32>
      %15 = arith.addf %12, %14 : vector<8x128xf32>
      %c0_14 = arith.constant 0 : index
      %c0_15 = arith.constant 0 : index
      %16 = vector.load %arg6[%c0_14, %c0_15] : memref<8x128xf32, #tpu.memory_space<vmem>>, vector<8x128xf32>
      tpu.vector_store %arg6[%c0_14, %c0_15], %15 {strides = array<i32>} : memref<8x128xf32, #tpu.memory_space<vmem>>, vector<8x128xf32>,
    } else {
    }
    return
  }
  func.func @transform_0(%arg0: i32, %arg1: i32, %arg2: i32) -> (i32, i32) {
    %c0_i32 = arith.constant 0 : i32
    return %arg0, %arg2 : i32, i32
  }
  func.func @transform_1(%arg0: i32, %arg1: i32, %arg2: i32) -> (i32, i32) {
    %c0_i32 = arith.constant 0 : i32
    return %arg2, %arg1 : i32, i32
  }
  func.func @transform_2(%arg0: i32, %arg1: i32, %arg2: i32) -> (i32, i32) {
    %c0_i32 = arith.constant 0 : i32
    %c0_i32_0 = arith.constant 0 : i32
    return %c0_i32, %arg1 : i32, i32
  }
  func.func @transform_3(%arg0: i32, %arg1: i32, %arg2: i32) -> (i32, i32) {
    %c0_i32 = arith.constant 0 : i32
    return %arg0, %arg1 : i32, i32
  }
}

</mosaic_0001>

<bundles_post_ra>
// kernel: forward.1
= control target key start
LH: loop header
LB: loop body
LE: loop exit
PB: predicated region body
PF: predicated region fallthrough
CT: control target
= control target key end

     0   :  { %8 = vsyncpa [#allocation3], 0  ;;  %s341_s0 = inlined_call_operand.vmem [shape: f32[8,128], index: 0, kind: input, shape index: {}]   ;;  %s342_s1 = inlined_call_operand.hbm [shape: f32[128,128], index: 1, kind: input, shape index: {}]   ;;  %s343_s2 = inlined_call_operand.vmem [shape: f32[1,128], index: 2, kind: input, shape index: {}]   ;;  %s344_s3 = inlined_call_operand.hbm [shape: f32[8,128], index: 3, kind: output, shape index: {}]  }
   0x1   :  { %9 = vsyncpa [#allocation4], 0  ;;  %s284_s12 = smov [#allocation2]   ;;  %s236_s16 = scalar_lea.hbm %s342_s1, 2048 }
   0x2   :  { %s17_s13 = sshll.u32 %s284_s12, 4  ;;  %p237_p0 = scmp.ne.s32.totalorder %s342_s1, %s236_s16  ;;  %s18_s13 = int_to_ptr.vmem [resolvable:$true] %s17_s13 }
   0x3   :  { %p240_p1 = scmp.lt.u32.totalorder %s236_s16, %s342_s1 }
   0x5   :  { %p242_p2 = pnand %p240_p1, %p237_p0 }
   0x7   :  { %245 = shalt.err (!%p242_p2)
}
   0x8   :  { %s246_s21 = scalar_lea.vmem %s18_s13, 2048  ;;  %p251_p4 = scmp.lt.s32.totalorder %s18_s13, %s18_s13 }
   0x9   :  { %p247_p3 = scmp.ne.s32.totalorder %s18_s13, %s246_s21  ;;  %p252_p5 = scmp.lt.s32.totalorder %s246_s21, %s246_s21 }
   0xb   :  { %p253_p6 = por %p252_p5, %p251_p4 }
   0xd   :  { %p254_p7 = pnand %p253_p6, %p247_p3 }
   0xf   :  { %257 = shalt.err (!%p254_p7)
}
  0x10   :  { %s285_s22 = smov 128   ;;  %s286_s23 = smov 8  }
  0x11   :  { %23 = dma.hbm_to_vmem [thread:$0]  %s342_s1, 2048, %s18_s13, [#allocation3], %s285_s22, %s285_s22, %s286_s23  }
  0x12   :  { %280 = dma.done.wait [#allocation3], 2048  }
  0x13   :  { %281 = vsyncadd [#allocation3], 4294965248  ;;  %v287_v0 = vmov 0.0|0.0   ;;  %vm288_vm0 = vmmov 0   ;;  %v289_v1 = vmov 0.0   ;;  %v36_v2 = vld [vmem:[#allocation2] sm:$0xff] }
  0x14   :  { %205 = vmatprep.subr.bf16.mxu0 %v287_v0  ;;  %202 = vmatprep.mubr.msk.f32.mxu0 %vm288_vm0, %v289_v1  ;;  %v37_v3 = vld [vmem:[#allocation2 + $0x8] sm:$0xff]  ;;  %v38_v4 = vld [vmem:[#allocation2 + $0x10] sm:$0xff]  ;;  %v39_v6 = vld [vmem:[#allocation2 + $0x18] sm:$0xff]  ;;  %s290_s29 = smov [#allocation5]  }
  0x15   :  { %v206_v5 = vpack.c.bf16 %v37_v3, %v36_v2  ;;  %v209_v7 = vpack.c.bf16 %v39_v6, %v38_v4  ;;  %v40_v8 = vld [vmem:[#allocation2 + $0x20] sm:$0xff]  ;;  %v41_v9 = vld [vmem:[#allocation2 + $0x28] sm:$0xff]  ;;  %v42_v11 = vld [vmem:[#allocation2 + $0x30] sm:$0xff]  ;;  %s143_s30 = sshll.u32 %s290_s29, 4  ;;  %s144_s30 = int_to_ptr.vmem [resolvable:$true] %s143_s30 }
  0x16   :  { %v212_v10 = vpack.c.bf16 %v41_v9, %v40_v8  ;;  %v43_v12 = vld [vmem:[#allocation2 + $0x38] sm:$0xff]  ;;  %v44_v14 = vld [vmem:[#allocation2 + $0x40] sm:$0xff]  ;;  %v45_v15 = vld [vmem:[#allocation2 + $0x48] sm:$0xff]  ;;  %s258_s4 = scalar_lea.vmem %s144_s30, 128  ;;  %p263_p9 = scmp.lt.s32.totalorder %s144_s30, %s144_s30 }
  0x17   :  { %207 = vmatpush3.bf16.msra.mxu0 %v206_v5  ;;  %v215_v13 = vpack.c.bf16 %v43_v12, %v42_v11  ;;  %v218_v16 = vpack.c.bf16 %v45_v15, %v44_v14  ;;  %v46_v17 = vld [vmem:[#allocation2 + $0x50] sm:$0xff]  ;;  %v47_v18 = vld [vmem:[#allocation2 + $0x58] sm:$0xff]  ;;  %v48_v20 = vld [vmem:[#allocation2 + $0x60] sm:$0xff]  ;;  %p259_p8 = scmp.ne.s32.totalorder %s144_s30, %s258_s4  ;;  %p264_p10 = scmp.lt.s32.totalorder %s258_s4, %s258_s4 }
  0x18   :  { %208 = vmatprep.subr.bf16.mxu0 %v287_v0  ;;  %v221_v19 = vpack.c.bf16 %v47_v18, %v46_v17  ;;  %v49_v21 = vld [vmem:[#allocation2 + $0x68] sm:$0xff]  ;;  %v50_v23 = vld [vmem:[#allocation2 + $0x70] sm:$0xff]  ;;  %v51_v24 = vld [vmem:[#allocation2 + $0x78] sm:$0xff] }
  0x19   :  { %v224_v22 = vpack.c.bf16 %v49_v21, %v48_v20  ;;  %v227_v25 = vpack.c.bf16 %v51_v24, %v50_v23  ;;  %v35_v26 = vld [vmem:[%s341_s0] sm:$0xff]  ;;  %p265_p11 = por %p264_p10, %p263_p9 }
  0x1a   :  { %v152_v28 = vld [vmem:[%s343_s2] ss:$0 sm:$0xff] }
  0x1b   :  { %210 = vmatpush3.bf16.msra.mxu0 %v209_v7  ;;  %p266_p12 = pnand %p265_p11, %p259_p8 }
  0x1c   :  { %211 = vmatprep.subr.bf16.mxu0 %v287_v0 }
  0x1f   :  { %213 = vmatpush3.bf16.msra.mxu0 %v212_v10 }
  0x20   :  { %214 = vmatprep.subr.bf16.mxu0 %v287_v0 }
  0x23   :  { %216 = vmatpush3.bf16.msra.mxu0 %v215_v13 }
  0x24   :  { %217 = vmatprep.subr.bf16.mxu0 %v287_v0 }
  0x27   :  { %219 = vmatpush3.bf16.msra.mxu0 %v218_v16 }
  0x28   :  { %220 = vmatprep.subr.bf16.mxu0 %v287_v0 }
  0x2b   :  { %222 = vmatpush3.bf16.msra.mxu0 %v221_v19 }
  0x2c   :  { %223 = vmatprep.subr.bf16.mxu0 %v287_v0 }
  0x2f   :  { %225 = vmatpush3.bf16.msra.mxu0 %v224_v22 }
  0x30   :  { %226 = vmatprep.subr.bf16.mxu0 %v287_v0 }
  0x33   :  { %228 = vmatpush3.bf16.msra.mxu0 %v227_v25 }
  0x36   :  { %203 = vmatmul.mubr.f32.vlgmr.msra.gmra.mrb[0].mxu0 %v35_v26 }
 0x109   :  { %v118_v27 = vpop.f32.mrb[0].mxu0 }
 0x10a   :  { %v204_v29 = vpop.f32.mrb[1].mxu0  ;;  %v135_v30 = vadd.f32 %v152_v28, %v118_v27 }
 0x10c   :  { %136 = vst [vmem:[#allocation5] sm:$0xff] %v135_v30 }
 0x10d   :  { %269 = shalt.err (!%p266_p12)
}
 0x10e   :  { %s270_s6 = scalar_lea.hbm %s344_s3, 128 }
 0x10f   :  { %p271_p13 = scmp.ne.s32.totalorder %s344_s3, %s270_s6  ;;  %p274_p0 = scmp.lt.u32.totalorder %s270_s6, %s344_s3 }
 0x111   :  { %p276_p1 = pnand %p274_p0, %p271_p13 }
 0x113   :  { %279 = shalt.err (!%p276_p1)
}
 0x114   :  { %146 = dma.vmem_to_hbm [thread:$0]  %s144_s30, 128, %s344_s3, [#allocation4]  }
 0x115   :  { %282 = dma.done.wait [#allocation4], 128  }
 0x116   :  { %283 = vsyncadd [#allocation4], 4294967168 }
 0x117   :  { %150 = vsyncpa [#allocation3], 1 }
 0x118   :  { %151 = vsyncpa [#allocation4], 1 }

</bundles_post_ra>
